<compile_context>
chip_gen: v5e
topology: v5e:2x2
jax: 0.10.0
libtpu: 0.0.40
codegen_flags: <defaults>
</compile_context>

<pallas_src>
import functools

import jax
import jax.numpy as jnp
from jax.experimental import pallas as pl
from jax.experimental.pallas import tpu as pltpu

LN_EPS = 1e-5  # PyTorch nn.LayerNorm default


def _round_up(x, m):
    return ((x + m - 1) // m) * m


def _choose_tile_rows(Mr, rK, rD, in_bytes, out_bytes, *, tm_max=2048,
                      vmem_budget=32 * 1024 * 1024):
    """Rows of the packed (Mr, rK) matrix per grid step.

    Accounts for: double-buffered x/out tiles, the resident weight (counted x2 buffers to
    be conservative), the fused (8-sublane padded) param block, the S/S^T stat matrices,
    and f32 intermediates of the epilogue."""
    fixed = 2 * (rK * rD * in_bytes + 8 * rD * 4 + rD * 128 * 4 + 8 * rD * 4)

    def per_step(t):
        return 2 * t * (rK * in_bytes + rD * out_bytes) + 4 * t * rD * 4

    tm = min(tm_max, _round_up(Mr, 8))
    while tm > 8 and fixed + per_step(tm) > vmem_budget:
        tm = max(8, _round_up(tm // 2, 8))

    if tm >= Mr:
        if Mr >= 32:
            # Prefer >= 2 grid steps: enables megacore sharding on v7x (2 TCs) and lets the
            # pipeline overlap the next tile's DMA with compute.
            tm = _round_up((Mr + 1) // 2, 8)
        else:
            return Mr  # single full-extent block (legal even if not a multiple of 8)
    return max(8, _round_up(tm, 8))


def _pe_kernel_plain(x_ref, w_ref, p_ref, o_ref, *, eps):
    # x_ref: (TM, K)   w_ref: (K, D)   p_ref: (3, D) f32 [bias; gamma; beta]   o_ref: (TM, D)
    # Conv-as-matmul on the MXU in the operands' native dtype, f32 accumulation.
    y = jnp.dot(x_ref[...], w_ref[...], preferred_element_type=jnp.float32)
    y = y + p_ref[0:1, :]
    # LayerNorm over the embedding (last) dim, statistics in f32.
    mean = jnp.mean(y, axis=-1, keepdims=True)
    c = y - mean
    var = jnp.mean(c * c, axis=-1, keepdims=True)
    inv = jax.lax.rsqrt(var + eps)
    # NOTE: rows of a partial last tile hold arbitrary VMEM data; their (possibly NaN) results
    # are dropped by the out-of-bounds write mask.  Never turn this into an accumulate-into-
    # output pattern.
    o_ref[...] = (c * inv * p_ref[1:2, :] + p_ref[2:3, :]).astype(o_ref.dtype)


def _pe_kernel_packed(x_ref, w_ref, p_ref, s_ref, st_ref, o_ref, *, inv_d, eps):
    # Lane-dense variant: r tokens packed per row.
    # x_ref: (TMr, r*K)   w_ref: (r*K, r*D) block-diagonal   p_ref: (3, r*D) f32
    # s_ref: (r*D, 8) 0/1 chunk selector, st_ref = s_ref^T   o_ref: (TMr, r*D)
    y = jnp.dot(x_ref[...], w_ref[...], preferred_element_type=jnp.float32)
    y = y + p_ref[0:1, :]
    s = s_ref[...]
    st = st_ref[...]
    # Per-D-chunk LayerNorm statistics, broadcast back to every lane of the chunk via two
    # tiny MXU matmuls (no in-kernel reshape/relayout needed).
    mean = jnp.dot(jnp.dot(y, s, preferred_element_type=jnp.float32), st,
                   preferred_element_type=jnp.float32) * inv_d
    c = y - mean
    var = jnp.dot(jnp.dot(c * c, s, preferred_element_type=jnp.float32), st,
                  preferred_element_type=jnp.float32) * inv_d
    inv = jax.lax.rsqrt(var + eps)
    # Garbage rows of a partial last tile are dropped by the OOB write mask (see note above).
    o_ref[...] = (c * inv * p_ref[1:2, :] + p_ref[2:3, :]).astype(o_ref.dtype)


def patch_embed_forward(x, conv_w, conv_b, ln_gamma, ln_beta, patch_size,
                        out_dtype=None, compute_dtype=None):
    """x: (B, C, H, W) NCHW.  conv_w: (D, C, ph, pw).  Returns ((B, N, D), (Hp, Wp))."""
    B, C, H, W = x.shape
    ph, pw = patch_size
    assert H % ph == 0 and W % pw == 0, "img_size must be divisible by patch_size"
    Hp, Wp = H // ph, W // pw
    N = Hp * Wp
    D = int(conv_w.shape[0])
    K = C * ph * pw
    M = B * N

    cdt = x.dtype if compute_dtype is None else jnp.dtype(compute_dtype)
    odt = x.dtype if out_dtype is None else jnp.dtype(out_dtype)

    # Lane-dense packing factor: r consecutive tokens per output row so the output tile's
    # last dim is exactly 128 lanes (D < 128 would otherwise hit masked vst partial stores).
    if D < 128 and 128 % D == 0 and M % (128 // D) == 0:
        r = 128 // D
    else:
        r = 1
    rK, rD, Mr = r * K, r * D, M // r

    # --- glue: non-overlapping patch extraction in (C, ph, pw) order to match the conv
    # weight layout.  allow_input_fusion lets XLA try to fuse this into the Pallas input DMA.
    xc = x.astype(cdt)
    xp = jnp.transpose(xc.reshape(B, C, Hp, ph, Wp, pw), (0, 2, 4, 1, 3, 5))  # (B,Hp,Wp,C,ph,pw)
    x2d = xp.reshape(Mr, rK)   # (M, K) row-merged into (M/r, r*K): a free contiguous view

    w2d = conv_w.reshape(D, K).T.astype(cdt)                  # (K, D), matmul in native dtype
    if r > 1:
        # Block-diagonal weight => the matmul directly produces the lane-dense packed output:
        # out_packed[t, k*D + d] = sum_q x2d[r*t + k, q] * w2d[q, d]
        w2d = jnp.kron(jnp.eye(r, dtype=cdt), w2d)            # (rK, rD)

    # bias / gamma / beta fused into one resident f32 operand (tiled per packed chunk).
    params = jnp.stack([jnp.tile(conv_b.astype(jnp.float32), r),
                        jnp.tile(ln_gamma.astype(jnp.float32), r),
                        jnp.tile(ln_beta.astype(jnp.float32), r)], axis=0)  # (3, rD)

    in_bytes = jnp.dtype(cdt).itemsize
    out_bytes = jnp.dtype(odt).itemsize
    tm = _choose_tile_rows(Mr, rK, rD, in_bytes, out_bytes)
    grid = (pl.cdiv(Mr, tm),)

    in_specs = [
        pl.BlockSpec((tm, rK), lambda i: (i, 0)),   # token rows: pipelined over the grid
        pl.BlockSpec((rK, rD), lambda i: (0, 0)),   # weights: resident across the grid
        pl.BlockSpec((3, rD), lambda i: (0, 0)),    # fused bias/gamma/beta: resident
    ]
    operands = [x2d, w2d, params]

    if r > 1:
        # 0/1 chunk-selector (rD, 8): column k marks lanes [k*D, (k+1)*D) for k < r, rest zero.
        s_small = jnp.kron(jnp.eye(r, dtype=jnp.float32), jnp.ones((D, 1), jnp.float32))
        s_cols = max(r, 8)
        S = jnp.concatenate(
            [s_small, jnp.zeros((rD, s_cols - r), jnp.float32)], axis=1) if s_cols > r else s_small
        in_specs += [pl.BlockSpec((rD, s_cols), lambda i: (0, 0)),
                     pl.BlockSpec((s_cols, rD), lambda i: (0, 0))]
        operands += [S, S.T]
        kernel = functools.partial(_pe_kernel_packed, inv_d=1.0 / D, eps=LN_EPS)
    else:
        kernel = functools.partial(_pe_kernel_plain, eps=LN_EPS)

    cost = pl.CostEstimate(
        flops=2 * Mr * rK * rD,
        transcendentals=M,  # one rsqrt per token row
        bytes_accessed=(Mr * rK + rK * rD) * in_bytes + 3 * rD * 4 + Mr * rD * out_bytes,
    )

    out2d = pl.pallas_call(
        kernel,
        out_shape=jax.ShapeDtypeStruct((Mr, rD), odt),
        grid_spec=pltpu.PrefetchScalarGridSpec(
            num_scalar_prefetch=0,
            grid=grid,
            in_specs=in_specs,
            out_specs=pl.BlockSpec((tm, rD), lambda i: (i, 0)),
        ),
        compiler_params=pltpu.CompilerParams(
            dimension_semantics=("parallel",),              # independent row tiles -> megacore
            vmem_limit_bytes=48 * 1024 * 1024,              # under v7x's 64 MiB physical / TC
            allow_input_fusion=[True] + [False] * (len(operands) - 1),
        ),
        cost_estimate=cost,
    )(*operands)

    # (Mr, r*D) row-major is exactly (M, D) row-major -> free reshapes back to (B, N, D).
    return out2d.reshape(B, N, D), (Hp, Wp)


if __name__ == "__main__":
    # Small config consistent with the module: img 16x16, patch 8, 4 input channels, embed_dim 32
    B, C, H, W = 2, 4, 16, 16
    ph = pw = 8
    D = 32

    key = jax.random.PRNGKey(0)
    kx, kw, kb = jax.random.split(key, 3)

    x = jax.random.normal(kx, (B, C, H, W), dtype=jnp.float32)
    conv_w = 0.02 * jax.random.normal(kw, (D, C, ph, pw), dtype=jnp.float32)
    conv_b = 0.01 * jax.random.normal(kb, (D,), dtype=jnp.float32)
    ln_gamma = jnp.ones((D,), dtype=jnp.float32)   # nn.LayerNorm default init
    ln_beta = jnp.zeros((D,), dtype=jnp.float32)

    fwd = jax.jit(patch_embed_forward,
                  static_argnames=("patch_size", "out_dtype", "compute_dtype"))
    out, (Hp, Wp) = fwd(x, conv_w, conv_b, ln_gamma, ln_beta, patch_size=(ph, pw))
    out = jax.block_until_ready(out)
    Hp, Wp = int(Hp), int(Wp)

    # Reference in plain JAX (conv-as-matmul + LayerNorm)
    Hp_ref, Wp_ref = H // ph, W // pw
    xp = jnp.transpose(x.reshape(B, C, Hp_ref, ph, Wp_ref, pw), (0, 2, 4, 1, 3, 5))
    xp = xp.reshape(B * Hp_ref * Wp_ref, -1)
    y_ref = xp @ conv_w.reshape(D, -1).T + conv_b
    mu = y_ref.mean(-1, keepdims=True)
    var = ((y_ref - mu) ** 2).mean(-1, keepdims=True)
    y_ref = ((y_ref - mu) / jnp.sqrt(var + LN_EPS)) * ln_gamma + ln_beta
    y_ref = y_ref.reshape(B, Hp_ref * Wp_ref, D)

    assert out.shape == (B, Hp_ref * Wp_ref, D), out.shape
    assert (Hp, Wp) == (Hp_ref, Wp_ref)
    assert jnp.allclose(out, y_ref, atol=2e-4, rtol=2e-4)
    print("KERNEL_OK")
</pallas_src>

<mosaic_0001>
module attributes {stable_mosaic.version = 11 : i64} {
  func.func @_pe_kernel_packed(%arg0: i32, %arg1: memref<2x1024xf32, #tpu.memory_space<vmem>>, %arg2: memref<1024x128xf32, #tpu.memory_space<vmem>>, %arg3: memref<3x128xf32, #tpu.memory_space<vmem>>, %arg4: memref<128x8xf32, #tpu.memory_space<vmem>>, %arg5: memref<8x128xf32, #tpu.memory_space<vmem>>, %arg6: memref<2x128xf32, #tpu.memory_space<vmem>>) attributes {dimension_semantics = [#tpu.dimension_semantics<parallel>], iteration_bounds = array<i64: 1>, scalar_prefetch = 0 : i64, scratch_operands = 0 : i64, tpu.core_type = #tpu.core_type<tc>, window_params = [{transform_indices = @transform_0, window_bounds = array<i64: 2, 1024>}, {pipeline_mode = #tpu.pipeline_mode<synchronous>, transform_indices = @transform_1, window_bounds = array<i64: 1024, 128>}, {pipeline_mode = #tpu.pipeline_mode<synchronous>, transform_indices = @transform_2, window_bounds = array<i64: 3, 128>}, {pipeline_mode = #tpu.pipeline_mode<synchronous>, transform_indices = @transform_3, window_bounds = array<i64: 128, 8>}, {pipeline_mode = #tpu.pipeline_mode<synchronous>, transform_indices = @transform_4, window_bounds = array<i64: 8, 128>}, {transform_indices = @transform_5, window_bounds = array<i64: 2, 128>}]} {
    %c0 = arith.constant 0 : index
    %c0_0 = arith.constant 0 : index
    %0 = vector.load %arg1[%c0, %c0_0] : memref<2x1024xf32, #tpu.memory_space<vmem>>, vector<2x1024xf32>
    %c0_1 = arith.constant 0 : index
    %c0_2 = arith.constant 0 : index
    %1 = vector.load %arg2[%c0_1, %c0_2] : memref<1024x128xf32, #tpu.memory_space<vmem>>, vector<1024x128xf32>
    %cst = arith.constant dense<0.000000e+00> : vector<2x128xf32>
    %2 = tpu.matmul %0, %1, %cst {dimension_numbers = #tpu.dot_dimension_numbers<[1], [0], [0], [1], [0, 0, 1, 1], [], []>} : vector<2x1024xf32>, vector<1024x128xf32>, vector<2x128xf32> -> vector<2x128xf32>
    %c0_3 = arith.constant 0 : index
    %c0_4 = arith.constant 0 : index
    %3 = vector.load %arg3[%c0_3, %c0_4] : memref<3x128xf32, #tpu.memory_space<vmem>>, vector<1x128xf32>
    %4 = vector.broadcast %3 : vector<1x128xf32> to vector<2x128xf32>
    %5 = arith.addf %2, %4 : vector<2x128xf32>
    %c0_5 = arith.constant 0 : index
    %c0_6 = arith.constant 0 : index
    %6 = vector.load %arg4[%c0_5, %c0_6] : memref<128x8xf32, #tpu.memory_space<vmem>>, vector<128x8xf32>
    %c0_7 = arith.constant 0 : index
    %c0_8 = arith.constant 0 : index
    %7 = vector.load %arg5[%c0_7, %c0_8] : memref<8x128xf32, #tpu.memory_space<vmem>>, vector<8x128xf32>
    %cst_9 = arith.constant dense<0.000000e+00> : vector<2x8xf32>
    %8 = tpu.matmul %5, %6, %cst_9 {dimension_numbers = #tpu.dot_dimension_numbers<[1], [0], [0], [1], [0, 0, 1, 1], [], []>} : vector<2x128xf32>, vector<128x8xf32>, vector<2x8xf32> -> vector<2x8xf32>
    %cst_10 = arith.constant dense<0.000000e+00> : vector<2x128xf32>
    %9 = tpu.matmul %8, %7, %cst_10 {dimension_numbers = #tpu.dot_dimension_numbers<[1], [0], [0], [1], [0, 0, 1, 1], [], []>} : vector<2x8xf32>, vector<8x128xf32>, vector<2x128xf32> -> vector<2x128xf32>
    %cst_11 = arith.constant 3.125000e-02 : f32
    %10 = vector.broadcast %cst_11 : f32 to vector<2x128xf32>
    %11 = arith.mulf %9, %10 : vector<2x128xf32>
    %12 = arith.subf %5, %11 : vector<2x128xf32>
    %13 = arith.mulf %12, %12 : vector<2x128xf32>
    %cst_12 = arith.constant dense<0.000000e+00> : vector<2x8xf32>
    %14 = tpu.matmul %13, %6, %cst_12 {dimension_numbers = #tpu.dot_dimension_numbers<[1], [0], [0], [1], [0, 0, 1, 1], [], []>} : vector<2x128xf32>, vector<128x8xf32>, vector<2x8xf32> -> vector<2x8xf32>
    %cst_13 = arith.constant dense<0.000000e+00> : vector<2x128xf32>
    %15 = tpu.matmul %14, %7, %cst_13 {dimension_numbers = #tpu.dot_dimension_numbers<[1], [0], [0], [1], [0, 0, 1, 1], [], []>} : vector<2x8xf32>, vector<8x128xf32>, vector<2x128xf32> -> vector<2x128xf32>
    %cst_14 = arith.constant 3.125000e-02 : f32
    %16 = vector.broadcast %cst_14 : f32 to vector<2x128xf32>
    %17 = arith.mulf %15, %16 : vector<2x128xf32>
    %cst_15 = arith.constant 9.99999974E-6 : f32
    %18 = vector.broadcast %cst_15 : f32 to vector<2x128xf32>
    %19 = arith.addf %17, %18 : vector<2x128xf32>
    %20 = math.rsqrt %19 : vector<2x128xf32>
    %21 = arith.mulf %12, %20 : vector<2x128xf32>
    %c1 = arith.constant 1 : index
    %c0_16 = arith.constant 0 : index
    %22 = vector.load %arg3[%c1, %c0_16] : memref<3x128xf32, #tpu.memory_space<vmem>>, vector<1x128xf32>
    %23 = vector.broadcast %22 : vector<1x128xf32> to vector<2x128xf32>
    %24 = arith.mulf %21, %23 : vector<2x128xf32>
    %c2 = arith.constant 2 : index
    %c0_17 = arith.constant 0 : index
    %25 = vector.load %arg3[%c2, %c0_17] : memref<3x128xf32, #tpu.memory_space<vmem>>, vector<1x128xf32>
    %26 = vector.broadcast %25 : vector<1x128xf32> to vector<2x128xf32>
    %27 = arith.addf %24, %26 : vector<2x128xf32>
    %c0_18 = arith.constant 0 : index
    %c0_19 = arith.constant 0 : index
    %28 = vector.load %arg6[%c0_18, %c0_19] : memref<2x128xf32, #tpu.memory_space<vmem>>, vector<2x128xf32>
    tpu.vector_store %arg6[%c0_18, %c0_19], %27 {strides = array<i32>} : memref<2x128xf32, #tpu.memory_space<vmem>>, vector<2x128xf32>,
    return
  }
  func.func @transform_0(%arg0: i32) -> (i32, i32) {
    %c0_i32 = arith.constant 0 : i32
    %c0_i32_0 = arith.constant 0 : i32
    return %arg0, %c0_i32 : i32, i32
  }
  func.func @transform_1(%arg0: i32) -> (i32, i32) {
    %c0_i32 = arith.constant 0 : i32
    %c0_i32_0 = arith.constant 0 : i32
    %c0_i32_1 = arith.constant 0 : i32
    return %c0_i32, %c0_i32_0 : i32, i32
  }
  func.func @transform_2(%arg0: i32) -> (i32, i32) {
    %c0_i32 = arith.constant 0 : i32
    %c0_i32_0 = arith.constant 0 : i32
    %c0_i32_1 = arith.constant 0 : i32
    return %c0_i32, %c0_i32_0 : i32, i32
  }
  func.func @transform_3(%arg0: i32) -> (i32, i32) {
    %c0_i32 = arith.constant 0 : i32
    %c0_i32_0 = arith.constant 0 : i32
    %c0_i32_1 = arith.constant 0 : i32
    return %c0_i32, %c0_i32_0 : i32, i32
  }
  func.func @transform_4(%arg0: i32) -> (i32, i32) {
    %c0_i32 = arith.constant 0 : i32
    %c0_i32_0 = arith.constant 0 : i32
    %c0_i32_1 = arith.constant 0 : i32
    return %c0_i32, %c0_i32_0 : i32, i32
  }
  func.func @transform_5(%arg0: i32) -> (i32, i32) {
    %c0_i32 = arith.constant 0 : i32
    %c0_i32_0 = arith.constant 0 : i32
    return %arg0, %c0_i32 : i32, i32
  }
}

</mosaic_0001>

<bundles_post_ra>
// kernel: tile.26
= control target key start
LH: loop header
LB: loop body
LE: loop exit
PB: predicated region body
PF: predicated region fallthrough
CT: control target
= control target key end

     0   :  { %s22_s0 = inlined_call_operand.vmem [shape: f32[32], index: 0, kind: input, shape index: {}]   ;;  %s23_s1 = inlined_call_operand.vmem [shape: f32[4,32], index: 1, kind: output, shape index: {}]  }
   0x1   :  { %v4_v0 = vld [vmem:[%s22_s0] ss:$0 sm:$0xff] }
   0x2   :  { %5 = vst [vmem:[%s23_s1] sm:$0xf] %v4_v0 }

// kernel: tile.29
= control target key start
LH: loop header
LB: loop body
LE: loop exit
PB: predicated region body
PF: predicated region fallthrough
CT: control target
= control target key end

     0   :  { %s37_s8 = smov 32   ;;  %s38_s9 = smov 64   ;;  %vm7_vm0 = vcmask 261120   ;;  %vm13_vm1 = vcmask 1048320   ;;  %vm19_vm2 = vcmask 785920   ;;  %vm25_vm3 = vcmask 523520   ;;  %s55_s0 = inlined_call_operand.vmem [shape: f32[4,32], index: 0, kind: input, shape index: {}]   ;;  %s56_s1 = inlined_call_operand.vmem [shape: f32[1,128], index: 1, kind: output, shape index: {}]  }
   0x1   :  { %v4_v0 = vld [vmem:[%s55_s0] sm:$0xf]  ;;  %s36_s0 = smov 96  }
   0x2   :  { %5 = vst [vmem:[#allocation1] sm:$0xf] %v4_v0 }
   0x9   :  { %v10_v1 = vld [vmem:[#allocation1 + $0x3] sm:$0x1]   ;;  %v22_v2 = vld [vmem:[#allocation1 + $0x1] sm:$0x1]   ;;  %v16_v3 = vld [vmem:[#allocation1 + $0x2] sm:$0x1]  }
   0xa   :  { %11 = vrot.lane.b32.xlu0 %v10_v1, %s36_s0  ;;  %23 = vrot.lane.b32.xlu1 %v22_v2, %s37_s8  ;;  %v6_v4 = vld [vmem:[#allocation1] sm:$0x1]  }
   0xb   :  { %8 = vst.msk [vmem:[#allocation0] sm:$0x1] %vm7_vm0, %v6_v4  }
  0x12   :  { %17 = vrot.lane.b32.xlu0 %v16_v3, %s38_s9 }
  0x7c   :  { %v12_v5 = vpop.permute.xlu0 %11   ;;  %v24_v6 = vpop.permute.xlu1 %23  }
  0x7d   :  { %14 = vst.msk [vmem:[#allocation0] sm:$0x1] %vm13_vm1, %v12_v5  }
  0x84   :  { %v18_v7 = vpop.permute.xlu0 %17  }
  0x85   :  { %20 = vst.msk [vmem:[#allocation0] sm:$0x1] %vm19_vm2, %v18_v7  }
  0x86   :  { %26 = vst.msk [vmem:[#allocation0] sm:$0x1] %vm25_vm3, %v24_v6  }
  0x8d   :  { %v29_v8 = vld [vmem:[#allocation0] sm:$0x1] }
  0x8e   :  { %32 = vst [vmem:[%s56_s1] sm:$0x1] %v29_v8 }

// kernel: patch_embed_forward.1
= control target key start
LH: loop header
LB: loop body
LE: loop exit
PB: predicated region body
PF: predicated region fallthrough
CT: control target
= control target key end

     0   :  { %vm370_vm0 = vcmask 64512   ;;  %s954_s1 = inlined_call_operand.vmem [shape: f32[1024,128], index: 1, kind: input, shape index: {}]   ;;  %s955_s0 = inlined_call_operand.vmem [shape: f32[2,1024], index: 0, kind: input, shape index: {}]   ;;  %s956_s2 = inlined_call_operand.vmem [shape: f32[3,128], index: 2, kind: input, shape index: {}]   ;;  %s957_s3 = inlined_call_operand.vmem [shape: f32[128,8], index: 3, kind: input, shape index: {}]   ;;  %s958_s4 = inlined_call_operand.vmem [shape: f32[8,128], index: 4, kind: input, shape index: {}]   ;;  %s959_s5 = inlined_call_operand.vmem [shape: f32[2,128], index: 5, kind: output, shape index: {}]  }
   0x1   :  { %v69_v0 = vld [vmem:[%s954_s1 + $0x178] sm:$0xff]  ;;  %v68_v2 = vld [vmem:[%s954_s1 + $0x170] sm:$0xff]  ;;  %v67_v6 = vld [vmem:[%s954_s1 + $0x168] sm:$0xff] }
   0x2   :  { %v37_v1 = vld [vmem:[%s954_s1 + $0x78] sm:$0xff]  ;;  %213 = vmatpush.msra.mxu2 %v69_v0  ;;  %v36_v4 = vld [vmem:[%s954_s1 + $0x70] sm:$0xff]  ;;  %v35_v8 = vld [vmem:[%s954_s1 + $0x68] sm:$0xff] }
   0x3   :  { %173 = vmatpush.msra.mxu0 %v37_v1  ;;  %v85_v3 = vld [vmem:[%s954_s1 + $0x1f8] sm:$0xff]  ;;  %v84_v7 = vld [vmem:[%s954_s1 + $0x1f0] sm:$0xff]  ;;  %v83_v10 = vld [vmem:[%s954_s1 + $0x1e8] sm:$0xff] }
   0x4   :  { %v53_v5 = vld [vmem:[%s954_s1 + $0xf8] sm:$0xff]  ;;  %233 = vmatpush.msra.mxu3 %v85_v3  ;;  %214 = vmatpush.msra.mxu2 %v68_v2  ;;  %v52_v9 = vld [vmem:[%s954_s1 + $0xf0] sm:$0xff]  ;;  %v66_v11 = vld [vmem:[%s954_s1 + $0x160] sm:$0xff] }
   0x5   :  { %193 = vmatpush.msra.mxu1 %v53_v5  ;;  %174 = vmatpush.msra.mxu0 %v36_v4  ;;  %v34_v12 = vld [vmem:[%s954_s1 + $0x60] sm:$0xff]  ;;  %v51_v13 = vld [vmem:[%s954_s1 + $0xe8] sm:$0xff]  ;;  %v65_v16 = vld [vmem:[%s954_s1 + $0x158] sm:$0xff] }
   0x6   :  { %234 = vmatpush.msra.mxu3 %v84_v7  ;;  %215 = vmatpush.msra.mxu2 %v67_v6  ;;  %v82_v14 = vld [vmem:[%s954_s1 + $0x1e0] sm:$0xff]  ;;  %v33_v17 = vld [vmem:[%s954_s1 + $0x58] sm:$0xff]  ;;  %v64_v20 = vld [vmem:[%s954_s1 + $0x150] sm:$0xff] }
   0x7   :  { %194 = vmatpush.msra.mxu1 %v52_v9  ;;  %175 = vmatpush.msra.mxu0 %v35_v8  ;;  %v50_v15 = vld [vmem:[%s954_s1 + $0xe0] sm:$0xff]  ;;  %v81_v18 = vld [vmem:[%s954_s1 + $0x1d8] sm:$0xff]  ;;  %v32_v21 = vld [vmem:[%s954_s1 + $0x50] sm:$0xff] }
   0x8   :  { %235 = vmatpush.msra.mxu3 %v83_v10  ;;  %216 = vmatpush.msra.mxu2 %v66_v11  ;;  %v49_v19 = vld [vmem:[%s954_s1 + $0xd8] sm:$0xff]  ;;  %v80_v22 = vld [vmem:[%s954_s1 + $0x1d0] sm:$0xff]  ;;  %v63_v24 = vld [vmem:[%s954_s1 + $0x148] sm:$0xff] }
   0x9   :  { %195 = vmatpush.msra.mxu1 %v51_v13  ;;  %176 = vmatpush.msra.mxu0 %v34_v12  ;;  %v48_v23 = vld [vmem:[%s954_s1 + $0xd0] sm:$0xff]  ;;  %v31_v25 = vld [vmem:[%s954_s1 + $0x48] sm:$0xff]  ;;  %v62_v28 = vld [vmem:[%s954_s1 + $0x140] sm:$0xff] }
   0xa   :  { %236 = vmatpush.msra.mxu3 %v82_v14  ;;  %217 = vmatpush.msra.mxu2 %v65_v16  ;;  %v79_v26 = vld [vmem:[%s954_s1 + $0x1c8] sm:$0xff]  ;;  %v30_v29 = vld [vmem:[%s954_s1 + $0x40] sm:$0xff]  ;;  %v61_v32 = vld [vmem:[%s954_s1 + $0x138] sm:$0xff] }
   0xb   :  { %196 = vmatpush.msra.mxu1 %v50_v15  ;;  %177 = vmatpush.msra.mxu0 %v33_v17  ;;  %v47_v27 = vld [vmem:[%s954_s1 + $0xc8] sm:$0xff]  ;;  %v78_v30 = vld [vmem:[%s954_s1 + $0x1c0] sm:$0xff]  ;;  %v29_v33 = vld [vmem:[%s954_s1 + $0x38] sm:$0xff] }
   0xc   :  { %237 = vmatpush.msra.mxu3 %v81_v18  ;;  %218 = vmatpush.msra.mxu2 %v64_v20  ;;  %v46_v31 = vld [vmem:[%s954_s1 + $0xc0] sm:$0xff]  ;;  %v77_v34 = vld [vmem:[%s954_s1 + $0x1b8] sm:$0xff]  ;;  %v60_v36 = vld [vmem:[%s954_s1 + $0x130] sm:$0xff] }
   0xd   :  { %197 = vmatpush.msra.mxu1 %v49_v19  ;;  %178 = vmatpush.msra.mxu0 %v32_v21  ;;  %v45_v35 = vld [vmem:[%s954_s1 + $0xb8] sm:$0xff]  ;;  %v28_v37 = vld [vmem:[%s954_s1 + $0x30] sm:$0xff]  ;;  %v59_v40 = vld [vmem:[%s954_s1 + $0x128] sm:$0xff] }
   0xe   :  { %238 = vmatpush.msra.mxu3 %v80_v22  ;;  %219 = vmatpush.msra.mxu2 %v63_v24  ;;  %v76_v38 = vld [vmem:[%s954_s1 + $0x1b0] sm:$0xff]  ;;  %v27_v41 = vld [vmem:[%s954_s1 + $0x28] sm:$0xff]  ;;  %v58_v44 = vld [vmem:[%s954_s1 + $0x120] sm:$0xff] }
   0xf   :  { %198 = vmatpush.msra.mxu1 %v48_v23  ;;  %179 = vmatpush.msra.mxu0 %v31_v25  ;;  %v44_v39 = vld [vmem:[%s954_s1 + $0xb0] sm:$0xff]  ;;  %v75_v42 = vld [vmem:[%s954_s1 + $0x1a8] sm:$0xff]  ;;  %v26_v45 = vld [vmem:[%s954_s1 + $0x20] sm:$0xff] }
  0x10   :  { %239 = vmatpush.msra.mxu3 %v79_v26  ;;  %220 = vmatpush.msra.mxu2 %v62_v28  ;;  %v43_v43 = vld [vmem:[%s954_s1 + $0xa8] sm:$0xff]  ;;  %v74_v46 = vld [vmem:[%s954_s1 + $0x1a0] sm:$0xff]  ;;  %v57_v48 = vld [vmem:[%s954_s1 + $0x118] sm:$0xff] }
  0x11   :  { %199 = vmatpush.msra.mxu1 %v47_v27  ;;  %180 = vmatpush.msra.mxu0 %v30_v29  ;;  %v42_v47 = vld [vmem:[%s954_s1 + $0xa0] sm:$0xff]  ;;  %v25_v49 = vld [vmem:[%s954_s1 + $0x18] sm:$0xff]  ;;  %v56_v52 = vld [vmem:[%s954_s1 + $0x110] sm:$0xff] }
  0x12   :  { %240 = vmatpush.msra.mxu3 %v78_v30  ;;  %221 = vmatpush.msra.mxu2 %v61_v32  ;;  %v73_v50 = vld [vmem:[%s954_s1 + $0x198] sm:$0xff]  ;;  %v24_v53 = vld [vmem:[%s954_s1 + $0x10] sm:$0xff]  ;;  %v55_v56 = vld [vmem:[%s954_s1 + $0x108] sm:$0xff] }
  0x13   :  { %200 = vmatpush.msra.mxu1 %v46_v31  ;;  %181 = vmatpush.msra.mxu0 %v29_v33  ;;  %v41_v51 = vld [vmem:[%s954_s1 + $0x98] sm:$0xff]  ;;  %v72_v54 = vld [vmem:[%s954_s1 + $0x190] sm:$0xff]  ;;  %v23_v57 = vld [vmem:[%s954_s1 + $0x8] sm:$0xff] }
  0x14   :  { %241 = vmatpush.msra.mxu3 %v77_v34  ;;  %222 = vmatpush.msra.mxu2 %v60_v36  ;;  %v40_v55 = vld [vmem:[%s954_s1 + $0x90] sm:$0xff]  ;;  %v71_v58 = vld [vmem:[%s954_s1 + $0x188] sm:$0xff]  ;;  %v54_v60 = vld [vmem:[%s954_s1 + $0x100] sm:$0xff] }
  0x15   :  { %201 = vmatpush.msra.mxu1 %v45_v35  ;;  %182 = vmatpush.msra.mxu0 %v28_v37  ;;  %v39_v59 = vld [vmem:[%s954_s1 + $0x88] sm:$0xff]  ;;  %v22_v61 = vld [vmem:[%s954_s1] sm:$0xff]  ;;  %v133_v62 = vld [vmem:[%s954_s1 + $0x378] sm:$0xff] }
  0x16   :  { %242 = vmatpush.msra.mxu3 %v76_v38  ;;  %223 = vmatpush.msra.mxu2 %v59_v40  ;;  %v70_v63 = vld [vmem:[%s954_s1 + $0x180] sm:$0xff]  ;;  %v101_v0 = vld [vmem:[%s954_s1 + $0x278] sm:$0xff]  ;;  %v132_v2 = vld [vmem:[%s954_s1 + $0x370] sm:$0xff] }
  0x17   :  { %202 = vmatpush.msra.mxu1 %v44_v39  ;;  %183 = vmatpush.msra.mxu0 %v27_v41  ;;  %v149_v1 = vld [vmem:[%s954_s1 + $0x3f8] sm:$0xff]  ;;  %v38_v3 = vld [vmem:[%s954_s1 + $0x80] sm:$0xff]  ;;  %v100_v4 = vld [vmem:[%s954_s1 + $0x270] sm:$0xff] }
  0x18   :  { %243 = vmatpush.msra.mxu3 %v75_v42  ;;  %224 = vmatpush.msra.mxu2 %v58_v44  ;;  %v117_v5 = vld [vmem:[%s954_s1 + $0x2f8] sm:$0xff]  ;;  %v131_v6 = vld [vmem:[%s954_s1 + $0x368] sm:$0xff]  ;;  %v148_v7 = vld [vmem:[%s954_s1 + $0x3f0] sm:$0xff] }
  0x19   :  { %203 = vmatpush.msra.mxu1 %v43_v43  ;;  %184 = vmatpush.msra.mxu0 %v26_v45  ;;  %v99_v8 = vld [vmem:[%s954_s1 + $0x268] sm:$0xff]  ;;  %v116_v9 = vld [vmem:[%s954_s1 + $0x2f0] sm:$0xff]  ;;  %v130_v10 = vld [vmem:[%s954_s1 + $0x360] sm:$0xff] }
  0x1a   :  { %244 = vmatpush.msra.mxu3 %v74_v46  ;;  %225 = vmatpush.msra.mxu2 %v57_v48  ;;  %v147_v11 = vld [vmem:[%s954_s1 + $0x3e8] sm:$0xff]  ;;  %v98_v12 = vld [vmem:[%s954_s1 + $0x260] sm:$0xff]  ;;  %v129_v15 = vld [vmem:[%s954_s1 + $0x358] sm:$0xff] }
  0x1b   :  { %204 = vmatpush.msra.mxu1 %v42_v47  ;;  %185 = vmatpush.msra.mxu0 %v25_v49  ;;  %v115_v13 = vld [vmem:[%s954_s1 + $0x2e8] sm:$0xff]  ;;  %v20_v14 = vld [vmem:[%s955_s0] sm:$0xff]  ;;  %v97_v17 = vld [vmem:[%s954_s1 + $0x258] sm:$0xff] }
  0x1c   :  { %245 = vmatpush.msra.mxu3 %v73_v50  ;;  %226 = vmatpush.msra.mxu2 %v56_v52  ;;  %v146_v16 = vld [vmem:[%s954_s1 + $0x3e0] sm:$0xff]  ;;  %154 = vst [vmem:[#allocation1] ss:$4 sm:$0xff] %v20_v14  ;;  %v128_v19 = vld [vmem:[%s954_s1 + $0x350] sm:$0xff]  ;;  %v145_v20 = vld [vmem:[%s954_s1 + $0x3d8] sm:$0xff] }
  0x1d   :  { %205 = vmatpush.msra.mxu1 %v41_v51  ;;  %186 = vmatpush.msra.mxu0 %v24_v53  ;;  %v114_v18 = vld [vmem:[%s954_s1 + $0x2e0] sm:$0xff]  ;;  %v96_v21 = vld [vmem:[%s954_s1 + $0x250] sm:$0xff]  ;;  %v113_v22 = vld [vmem:[%s954_s1 + $0x2d8] sm:$0xff] }
  0x1e   :  { %246 = vmatpush.msra.mxu3 %v72_v54  ;;  %227 = vmatpush.msra.mxu2 %v55_v56  ;;  %v127_v23 = vld [vmem:[%s954_s1 + $0x348] sm:$0xff]  ;;  %v144_v24 = vld [vmem:[%s954_s1 + $0x3d0] sm:$0xff]  ;;  %v126_v28 = vld [vmem:[%s954_s1 + $0x340] sm:$0xff] }
  0x1f   :  { %206 = vmatpush.msra.mxu1 %v40_v55  ;;  %187 = vmatpush.msra.mxu0 %v23_v57  ;;  %v21_v25 = vld [vmem:[%s955_s0 + $0x8] sm:$0xff]  ;;  %v112_v27 = vld [vmem:[%s954_s1 + $0x2d0] sm:$0xff]  ;;  %v94_v30 = vld [vmem:[%s954_s1 + $0x240] sm:$0xff] }
  0x20   :  { %247 = vmatpush.msra.mxu3 %v71_v58  ;;  %228 = vmatpush.msra.mxu2 %v54_v60  ;;  %v95_v26 = vld [vmem:[%s954_s1 + $0x248] sm:$0xff]  ;;  %156 = vst [vmem:[#allocation1 + $0x20] ss:$4 sm:$0xff] %v21_v25  ;;  %v125_v32 = vld [vmem:[%s954_s1 + $0x338] sm:$0xff]  ;;  %v142_v33 = vld [vmem:[%s954_s1 + $0x3c0] sm:$0xff] }
  0x21   :  { %207 = vmatpush.msra.mxu1 %v39_v59  ;;  %188 = vmatpush.msra.mxu0 %v22_v61  ;;  %v143_v29 = vld [vmem:[%s954_s1 + $0x3c8] sm:$0xff]  ;;  %v93_v34 = vld [vmem:[%s954_s1 + $0x238] sm:$0xff]  ;;  %v110_v35 = vld [vmem:[%s954_s1 + $0x2c0] sm:$0xff] }
  0x22   :  { %293 = vmatpush.msrb.mxu2 %v133_v62  ;;  %248 = vmatpush.msra.mxu3 %v70_v63  ;;  %v111_v31 = vld [vmem:[%s954_s1 + $0x2c8] sm:$0xff]  ;;  %v124_v36 = vld [vmem:[%s954_s1 + $0x330] sm:$0xff]  ;;  %v141_v37 = vld [vmem:[%s954_s1 + $0x3b8] sm:$0xff] }
  0x23   :  { %253 = vmatpush.msrb.mxu0 %v101_v0  ;;  %208 = vmatpush.msra.mxu1 %v38_v3  ;;  %v92_v38 = vld [vmem:[%s954_s1 + $0x230] sm:$0xff]  ;;  %v109_v39 = vld [vmem:[%s954_s1 + $0x2b8] sm:$0xff]  ;;  %v123_v40 = vld [vmem:[%s954_s1 + $0x328] sm:$0xff] }
  0x24   :  { %313 = vmatpush.msrb.mxu3 %v149_v1  ;;  %294 = vmatpush.msrb.mxu2 %v132_v2  ;;  %v140_v41 = vld [vmem:[%s954_s1 + $0x3b0] sm:$0xff]  ;;  %v91_v42 = vld [vmem:[%s954_s1 + $0x228] sm:$0xff]  ;;  %v122_v44 = vld [vmem:[%s954_s1 + $0x320] sm:$0xff] }
  0x25   :  { %254 = vmatpush.msrb.mxu0 %v100_v4  ;;  %273 = vmatpush.msrb.mxu1 %v117_v5  ;;  %v108_v43 = vld [vmem:[%s954_s1 + $0x2b0] sm:$0xff]  ;;  %v139_v45 = vld [vmem:[%s954_s1 + $0x3a8] sm:$0xff]  ;;  %v90_v47 = vld [vmem:[%s954_s1 + $0x220] sm:$0xff] }
  0x26   :  { %295 = vmatpush.msrb.mxu2 %v131_v6  ;;  %314 = vmatpush.msrb.mxu3 %v148_v7  ;;  %v159_v46 = vld.sshfl [vmem:[#allocation1 + $0x10] sm:$0xff pattern:$0x73625140]  ;;  %v107_v48 = vld [vmem:[%s954_s1 + $0x2a8] sm:$0xff]  ;;  %v121_v49 = vld [vmem:[%s954_s1 + $0x318] sm:$0xff] }
  0x27   :  { %255 = vmatpush.msrb.mxu0 %v99_v8  ;;  %274 = vmatpush.msrb.mxu1 %v116_v9  ;;  %v138_v50 = vld [vmem:[%s954_s1 + $0x3a0] sm:$0xff]  ;;  %v160_v52 = vld.sshfl [vmem:[#allocation1 + $0x18] sm:$0xff pattern:$0x73625140]  ;;  %v120_v55 = vld [vmem:[%s954_s1 + $0x310] sm:$0xff] }
  0x28   :  { %296 = vmatpush.msrb.mxu2 %v130_v10  ;;  %315 = vmatpush.msrb.mxu3 %v147_v11  ;;  %v157_v51 = vld.sshfl [vmem:[#allocation1] sm:$0xff pattern:$0x73625140]  ;;  %v89_v53 = vld [vmem:[%s954_s1 + $0x218] sm:$0xff]  ;;  %v88_v58 = vld [vmem:[%s954_s1 + $0x210] sm:$0xff] }
  0x29   :  { %256 = vmatpush.msrb.mxu0 %v98_v12  ;;  %275 = vmatpush.msrb.mxu1 %v115_v13  ;;  %v106_v54 = vld [vmem:[%s954_s1 + $0x2a0] sm:$0xff]  ;;  %v137_v56 = vld [vmem:[%s954_s1 + $0x398] sm:$0xff]  ;;  %v158_v57 = vld.sshfl [vmem:[#allocation1 + $0x8] sm:$0xff pattern:$0x73625140] }
  0x2a   :  { %297 = vmatpush.msrb.mxu2 %v129_v15  ;;  %316 = vmatpush.msrb.mxu3 %v146_v16  ;;  %v105_v59 = vld [vmem:[%s954_s1 + $0x298] sm:$0xff]  ;;  %v119_v60 = vld [vmem:[%s954_s1 + $0x308] sm:$0xff]  ;;  %v136_v61 = vld [vmem:[%s954_s1 + $0x390] sm:$0xff] }
  0x2b   :  { %257 = vmatpush.msrb.mxu0 %v97_v17  ;;  %276 = vmatpush.msrb.mxu1 %v114_v18  ;;  %v87_v62 = vld [vmem:[%s954_s1 + $0x208] sm:$0xff]  ;;  %v104_v63 = vld [vmem:[%s954_s1 + $0x290] sm:$0xff]  ;;  %v118_v0 = vld [vmem:[%s954_s1 + $0x300] sm:$0xff] }
  0x2c   :  { %298 = vmatpush.msrb.mxu2 %v128_v19  ;;  %317 = vmatpush.msrb.mxu3 %v145_v20  ;;  %v135_v1 = vld [vmem:[%s954_s1 + $0x388] sm:$0xff]  ;;  %v163_v2 = vld.sshfl [vmem:[#allocation1 + $0x30] sm:$0xff pattern:$0x73625140]  ;;  %v86_v3 = vld [vmem:[%s954_s1 + $0x200] sm:$0xff] }
  0x2d   :  { %258 = vmatpush.msrb.mxu0 %v96_v21  ;;  %277 = vmatpush.msrb.mxu1 %v113_v22  ;;  %v103_v4 = vld [vmem:[%s954_s1 + $0x288] sm:$0xff]  ;;  %v134_v5 = vld [vmem:[%s954_s1 + $0x380] sm:$0xff]  ;;  %v164_v7 = vld.sshfl [vmem:[#allocation1 + $0x38] sm:$0xff pattern:$0x73625140] }
  0x2e   :  { %299 = vmatpush.msrb.mxu2 %v127_v23  ;;  %318 = vmatpush.msrb.mxu3 %v144_v24  ;;  %v161_v6 = vld.sshfl [vmem:[#allocation1 + $0x20] sm:$0xff pattern:$0x73625140]  ;;  %v348_v9 = vld [vmem:[%s957_s3 + $0x78] sm:$0xff]  ;;  %v347_v11 = vld [vmem:[%s957_s3 + $0x70] sm:$0xff] }
  0x2f   :  { %259 = vmatpush.msrb.mxu0 %v95_v26  ;;  %278 = vmatpush.msrb.mxu1 %v112_v27  ;;  %v102_v8 = vld [vmem:[%s954_s1 + $0x280] sm:$0xff]  ;;  %v162_v10 = vld.sshfl [vmem:[#allocation1 + $0x28] sm:$0xff pattern:$0x73625140]  ;;  %v344_v14 = vld [vmem:[%s957_s3 + $0x58] sm:$0xff] }
  0x30   :  { %300 = vmatpush.msrb.mxu2 %v126_v28  ;;  %319 = vmatpush.msrb.mxu3 %v143_v29  ;;  %v346_v12 = vld [vmem:[%s957_s3 + $0x68] sm:$0xff]  ;;  %v345_v13 = vld [vmem:[%s957_s3 + $0x60] sm:$0xff]  ;;  %v343_v15 = vld [vmem:[%s957_s3 + $0x50] sm:$0xff] }
  0x31   :  { %260 = vmatpush.msrb.mxu0 %v94_v30  ;;  %279 = vmatpush.msrb.mxu1 %v111_v31  ;;  %v342_v16 = vld [vmem:[%s957_s3 + $0x48] sm:$0xff]  ;;  %v341_v17 = vld [vmem:[%s957_s3 + $0x40] sm:$0xff]  ;;  %v340_v18 = vld [vmem:[%s957_s3 + $0x38] sm:$0xff] }
  0x32   :  { %301 = vmatpush.msrb.mxu2 %v125_v32  ;;  %320 = vmatpush.msrb.mxu3 %v142_v33  ;;  %v339_v19 = vld [vmem:[%s957_s3 + $0x30] sm:$0xff]  ;;  %v338_v20 = vld [vmem:[%s957_s3 + $0x28] sm:$0xff]  ;;  %v337_v21 = vld [vmem:[%s957_s3 + $0x20] sm:$0xff] }
  0x33   :  { %261 = vmatpush.msrb.mxu0 %v93_v34  ;;  %280 = vmatpush.msrb.mxu1 %v110_v35  ;;  %v336_v22 = vld [vmem:[%s957_s3 + $0x18] sm:$0xff]  ;;  %v335_v23 = vld [vmem:[%s957_s3 + $0x10] sm:$0xff]  ;;  %v334_v24 = vld [vmem:[%s957_s3 + $0x8] sm:$0xff] }
  0x34   :  { %302 = vmatpush.msrb.mxu2 %v124_v36  ;;  %321 = vmatpush.msrb.mxu3 %v141_v37  ;;  %v333_v25 = vld [vmem:[%s957_s3] sm:$0xff] }
  0x35   :  { %262 = vmatpush.msrb.mxu0 %v92_v38  ;;  %281 = vmatpush.msrb.mxu1 %v109_v39  ;;  %v349_v26 = vld [vmem:[%s958_s4] sm:$0xff] }
  0x36   :  { %303 = vmatpush.msrb.mxu2 %v123_v40  ;;  %322 = vmatpush.msrb.mxu3 %v140_v41  ;;  %v466_v27 = vld [vmem:[%s956_s2] ss:$0 sm:$0xff] }
  0x37   :  { %263 = vmatpush.msrb.mxu0 %v91_v42  ;;  %282 = vmatpush.msrb.mxu1 %v108_v43 }
  0x38   :  { %304 = vmatpush.msrb.mxu2 %v122_v44  ;;  %323 = vmatpush.msrb.mxu3 %v139_v45 }
  0x39   :  { %229 = vmatmul.f32.vlgmr.msra.gmra.mxu2 %v159_v46  ;;  %264 = vmatpush.msrb.mxu0 %v90_v47 }
  0x3a   :  { %283 = vmatpush.msrb.mxu1 %v107_v48  ;;  %305 = vmatpush.msrb.mxu2 %v121_v49 }
  0x3b   :  { %324 = vmatpush.msrb.mxu3 %v138_v50  ;;  %189 = vmatmul.f32.vlgmr.msra.gmra.mxu0 %v157_v51 }
  0x3c   :  { %249 = vmatmul.f32.vlgmr.msra.gmra.mxu3 %v160_v52  ;;  %265 = vmatpush.msrb.mxu0 %v89_v53 }
  0x3d   :  { %284 = vmatpush.msrb.mxu1 %v106_v54  ;;  %306 = vmatpush.msrb.mxu2 %v120_v55 }
  0x3e   :  { %325 = vmatpush.msrb.mxu3 %v137_v56  ;;  %209 = vmatmul.f32.vlgmr.msra.gmra.mxu1 %v158_v57 }
  0x3f   :  { %266 = vmatpush.msrb.mxu0 %v88_v58  ;;  %285 = vmatpush.msrb.mxu1 %v105_v59  ;;  %v467_v59 = vld [vmem:[%s956_s2 + $0x1] ss:$0 sm:$0xff] }
  0x40   :  { %307 = vmatpush.msrb.mxu2 %v119_v60  ;;  %326 = vmatpush.msrb.mxu3 %v136_v61  ;;  %v468_v61 = vld [vmem:[%s956_s2 + $0x2] ss:$0 sm:$0xff] }
  0x41   :  { %267 = vmatpush.msrb.mxu0 %v87_v62  ;;  %286 = vmatpush.msrb.mxu1 %v104_v63 }
  0x42   :  { %308 = vmatpush.msrb.mxu2 %v118_v0  ;;  %327 = vmatpush.msrb.mxu3 %v135_v1 }
  0x43   :  { %309 = vmatmul.f32.vlgmr.msrb.gmra.mxu2 %v163_v2  ;;  %268 = vmatpush.msrb.mxu0 %v86_v3 }
  0x44   :  { %287 = vmatpush.msrb.mxu1 %v103_v4  ;;  %328 = vmatpush.msrb.mxu3 %v134_v5 }
  0x45   :  { %269 = vmatmul.f32.vlgmr.msrb.gmra.mxu0 %v161_v6  ;;  %329 = vmatmul.f32.vlgmr.msrb.gmra.mxu3 %v164_v7 }
  0x46   :  { %288 = vmatpush.msrb.mxu1 %v102_v8  ;;  %350 = vmatpush.msra.mxu0 %v348_v9 }
  0x47   :  { %289 = vmatmul.f32.vlgmr.msrb.gmra.mxu1 %v162_v10  ;;  %397 = vmatpush.msra.mxu2 %v348_v9 }
  0x48   :  { %351 = vmatpush.msra.mxu0 %v347_v11  ;;  %389 = vmatpush.msra.mxu1 %v349_v26 }
  0x49   :  { %398 = vmatpush.msra.mxu2 %v347_v11  ;;  %435 = vmatpush.msra.mxu3 %v349_v26 }
  0x4a   :  { %352 = vmatpush.msra.mxu0 %v346_v12 }
  0x4b   :  { %399 = vmatpush.msra.mxu2 %v346_v12 }
  0x4c   :  { %353 = vmatpush.msra.mxu0 %v345_v13 }
  0x4d   :  { %400 = vmatpush.msra.mxu2 %v345_v13 }
  0x4e   :  { %354 = vmatpush.msra.mxu0 %v344_v14 }
  0x4f   :  { %401 = vmatpush.msra.mxu2 %v344_v14 }
  0x50   :  { %355 = vmatpush.msra.mxu0 %v343_v15 }
  0x51   :  { %402 = vmatpush.msra.mxu2 %v343_v15 }
  0x52   :  { %356 = vmatpush.msra.mxu0 %v342_v16 }
  0x53   :  { %403 = vmatpush.msra.mxu2 %v342_v16 }
  0x54   :  { %357 = vmatpush.msra.mxu0 %v341_v17 }
  0x55   :  { %404 = vmatpush.msra.mxu2 %v341_v17 }
  0x56   :  { %358 = vmatpush.msra.mxu0 %v340_v18 }
  0x57   :  { %405 = vmatpush.msra.mxu2 %v340_v18 }
  0x58   :  { %359 = vmatpush.msra.mxu0 %v339_v19 }
  0x59   :  { %406 = vmatpush.msra.mxu2 %v339_v19 }
  0x5a   :  { %360 = vmatpush.msra.mxu0 %v338_v20 }
  0x5b   :  { %407 = vmatpush.msra.mxu2 %v338_v20 }
  0x5c   :  { %361 = vmatpush.msra.mxu0 %v337_v21 }
  0x5d   :  { %408 = vmatpush.msra.mxu2 %v337_v21 }
  0x5e   :  { %362 = vmatpush.msra.mxu0 %v336_v22 }
  0x5f   :  { %409 = vmatpush.msra.mxu2 %v336_v22 }
  0x60   :  { %363 = vmatpush.msra.mxu0 %v335_v23 }
  0x61   :  { %410 = vmatpush.msra.mxu2 %v335_v23 }
  0x62   :  { %364 = vmatpush.msra.mxu0 %v334_v24 }
  0x63   :  { %411 = vmatpush.msra.mxu2 %v334_v24 }
  0x64   :  { %365 = vmatpush.msra.mxu0 %v333_v25 }
  0x65   :  { %412 = vmatpush.msra.mxu2 %v333_v25 }
  0xb8   :  { %v190_v28 = vpop.f32.mrf.mxu0 }
  0xb9   :  { %v191_v29 = vadd.f32 %v466_v27, %v190_v28 }
  0xbb   :  { %v210_v30 = vpop.f32.mrf.mxu1 }
  0xbc   :  { %v211_v31 = vadd.f32 %v210_v30, %v191_v29  ;;  %v230_v32 = vpop.f32.mrf.mxu2 }
  0xbe   :  { %v231_v33 = vadd.f32 %v230_v32, %v211_v31 }
  0xbf   :  { %v250_v34 = vpop.f32.mrf.mxu3 }
  0xc0   :  { %v251_v35 = vadd.f32 %v250_v34, %v231_v33 }
  0xc2   :  { %v270_v36 = vpop.f32.mrf.mxu0 }
  0xc3   :  { %v271_v37 = vadd.f32 %v270_v36, %v251_v35 }
  0xc4   :  { %v290_v38 = vpop.f32.mrf.mxu1 }
  0xc5   :  { %v291_v39 = vadd.f32 %v290_v38, %v271_v37 }
  0xc6   :  { %v310_v40 = vpop.f32.mrf.mxu2 }
  0xc7   :  { %v311_v41 = vadd.f32 %v310_v40, %v291_v39 }
  0xc8   :  { %v330_v42 = vpop.f32.mrf.mxu3 }
  0xc9   :  { %v331_v43 = vadd.f32 %v330_v42, %v311_v41 }
  0xcb   :  { %366 = vmatmul.f32.vlgmr.msra.gmra.mxu0 %v331_v43 }
 0x148   :  { %v367_v44 = vpop.f32.mrf.mxu0 }
 0x149   :  { %464 = vmatmul.msk.f32.vlgmr.msra.gmra.mxu1 %vm370_vm0, %v367_v44 }
 0x1c6   :  { %v391_v45 = vpop.f32.mrf.mxu1 }
 0x1c7   :  { %v394_v46 = vmul.f32 0.03125, %v391_v45 }
 0x1c9   :  { %v395_v47 = vsub.f32 %v331_v43, %v394_v46 }
 0x1cb   :  { %v396_v48 = vmul.f32 %v395_v47, %v395_v47 }
 0x1cd   :  { %413 = vmatmul.f32.vlgmr.msra.gmra.mxu2 %v396_v48 }
 0x250   :  { %v414_v49 = vpop.f32.mrf.mxu2 }
 0x251   :  { %465 = vmatmul.msk.f32.vlgmr.msra.gmra.mxu3 %vm370_vm0, %v414_v49 }
 0x2d4   :  { %v437_v50 = vpop.f32.mrf.mxu3 }
 0x2d5   :  { %v440_v51 = vmul.f32 0.03125, %v437_v50 }
 0x2d7   :  { %v441_v52 = vadd.f32 1e-05, %v440_v51 }
 0x2d9   :  { %469 = vrsqrt.f32 %v441_v52  ;;  %vm448_vm2 = vweird.f32 %v441_v52 }
 0x2df   :  { %v470_v53 = vpop.eup %469 }
 0x2e0   :  { %v443_v54 = vmul.f32 %v470_v53, %v441_v52  ;;  %vm449_vm1 = vweird.f32 %v470_v53 }
 0x2e1   :  { %vm450_vm3 = vmor %vm448_vm2, %vm449_vm1 }
 0x2e2   :  { %v444_v55 = vmul.f32 %v470_v53, %v443_v54 }
 0x2e4   :  { %v445_v56 = vmul.f32 0.5, %v444_v55 }
 0x2e6   :  { %v446_v57 = vsub.f32 1.5, %v445_v56 }
 0x2e8   :  { %v447_v58 = vmul.f32 %v470_v53, %v446_v57 }
 0x2ea   :  { %v451_v60 = vsel %vm450_vm3, %v470_v53, %v447_v58 }
 0x2eb   :  { %v452_v62 = vmul.f32 %v451_v60, %v395_v47 }
 0x2ed   :  { %v455_v63 = vmul.f32 %v467_v59, %v452_v62 }
 0x2ef   :  { %v458_v0 = vadd.f32 %v468_v61, %v455_v63 }
 0x2f1   :  { %459 = vst [vmem:[%s959_s5] sm:$0x3] %v458_v0 }

</bundles_post_ra>
